<compile_context>
chip_gen: v5e
topology: v5e:2x2
jax: 0.10.0
libtpu: 0.0.40
codegen_flags: <defaults>
</compile_context>

<pallas_src>
import jax
import jax.numpy as jnp
from jax import lax
from jax.experimental import pallas as pl
from jax.experimental.pallas import tpu as pltpu

LANES = 128            # lane width (fast axis) — batch maps here
CHUNK = 16             # sublane rows per inner-loop step: each live f32
                       # (CHUNK, 128) value is 2 vregs -> body stays in vregs
R_MAX = 1024           # sublane rows per grid step: 9*1024*128*4B ≈ 4.7 MB
                       # input block; double-buffered in+out ≈ 10.5 MB
VMEM_LIMIT = 32 * 1024 * 1024   # headroom on v5e (16 MiB default scoped)


def _solid_angle_kernel(x_ref, o_ref):
    # x_ref: (9, R, 128)  planes = [ax, ay, az, bx, by, bz, cx, cy, cz]
    # o_ref: (R, 128)
    n_chunks = x_ref.shape[1] // CHUNK

    def body(ci, carry):
        base = pl.multiple_of(ci * CHUNK, CHUNK)
        rows = pl.ds(base, CHUNK)

        ax = x_ref[0, rows, :]
        ay = x_ref[1, rows, :]
        az = x_ref[2, rows, :]
        bx = x_ref[3, rows, :]
        by = x_ref[4, rows, :]
        bz = x_ref[5, rows, :]
        cx = x_ref[6, rows, :]
        cy = x_ref[7, rows, :]
        cz = x_ref[8, rows, :]

        # cross(b, c)
        crx = by * cz - bz * cy
        cry = bz * cx - bx * cz
        crz = bx * cy - by * cx
        # det([a; b; c]) = a . (b x c)
        face_det = ax * crx + ay * cry + az * crz

        # per-vertex norms
        na = jnp.sqrt(ax * ax + ay * ay + az * az)
        nb = jnp.sqrt(bx * bx + by * by + bz * bz)
        nc = jnp.sqrt(cx * cx + cy * cy + cz * cz)

        # pairwise dot products
        ab = ax * bx + ay * by + az * bz
        bc = bx * cx + by * cy + bz * cz
        ac = ax * cx + ay * cy + az * cz

        denom = na * nb * nc + bc * na + ac * nb + ab * nc
        o_ref[rows, :] = 2.0 * jnp.arctan2(face_det, denom)
        return carry

    lax.fori_loop(0, n_chunks, body, None)


def _cdiv(a, b):
    return -(-a // b)


def _round_up(v, m):
    return _cdiv(v, m) * m


def _num_tensorcores():
    # v7x exposes 2 TensorCores per device ("parallel" grid axes shard across
    # them); v5e/v6e have a single TensorCore per device.
    try:
        kind = jax.devices()[0].device_kind.lower()
        if "7" in kind:
            return 2
    except Exception:
        pass
    return 1


@jax.jit
def solid_angle(batch_of_three_vectors):
    assert batch_of_three_vectors.shape[-1] == 3
    assert batch_of_three_vectors.shape[-2] == 3
    x = batch_of_three_vectors.astype(jnp.float32)
    B = x.shape[0]

    # Tiling: G = number of 128-lane rows needed for the batch.
    G = _cdiv(B, LANES)
    R = min(R_MAX, _round_up(G, CHUNK))
    n_blocks = _cdiv(G, R)
    # Only force extra grid steps on multi-TensorCore chips (v7x); on
    # v5e/v6e a forced split is pure per-step overhead.
    ncores = _num_tensorcores()
    if ncores > 1 and n_blocks < ncores and G > CHUNK:
        R = _round_up(_cdiv(G, ncores), CHUNK)
        n_blocks = _cdiv(G, R)
    Gp = n_blocks * R
    Bp = Gp * LANES

    # Repack [B, 3, 3] -> [9, Gp, 128]: component-major, batch on
    # (sublanes, lanes).  Under jit the pad + transpose fuse into a single
    # HBM copy pass.  Zero padding is harmless: arctan2(0, 0) == 0 and the
    # padded lanes are sliced off at the end.
    x_flat = x.reshape(B, 9)
    if Bp != B:
        x_flat = jnp.pad(x_flat, ((0, Bp - B), (0, 0)))
    x9 = jnp.transpose(x_flat, (1, 0)).reshape(9, Gp, LANES)
    # TODO(synk): if the producer can emit the component-major [9, B] slab
    # directly, this repack pass (the only HBM traffic beyond the kernel's
    # own 36B read + 4B write per triangle) disappears entirely.

    out = pl.pallas_call(
        _solid_angle_kernel,
        out_shape=jax.ShapeDtypeStruct((Gp, LANES), jnp.float32),
        grid=(n_blocks,),
        in_specs=[pl.BlockSpec((9, R, LANES), lambda i: (0, i, 0))],
        out_specs=pl.BlockSpec((R, LANES), lambda i: (i, 0)),
        compiler_params=pltpu.CompilerParams(
            dimension_semantics=("parallel",),
            vmem_limit_bytes=VMEM_LIMIT),
    )(x9)

    return out.reshape(Bp)[:B]


def _solid_angle_ref(x):
    # Pure-JAX reference mirroring the PyTorch forward.
    a = x[..., 0, :]
    b = x[..., 1, :]
    c = x[..., 2, :]
    face_det = jnp.sum(a * jnp.cross(b, c), axis=-1)
    norms = jnp.linalg.norm(x, axis=-1)
    abc = jnp.prod(norms, axis=-1)
    ab = jnp.sum(a * b, axis=-1)
    bc = jnp.sum(b * c, axis=-1)
    ac = jnp.sum(a * c, axis=-1)
    denom = (abc
             + bc * norms[..., 0]
             + ac * norms[..., 1]
             + ab * norms[..., 2])
    return 2.0 * jnp.arctan2(face_det, denom)


if __name__ == "__main__":
    key = jax.random.PRNGKey(0)
    B = 16
    x = jax.random.normal(key, (B, 3, 3), dtype=jnp.float32)

    out = jax.block_until_ready(solid_angle(x))
    ref = _solid_angle_ref(x)
    assert out.shape == (B,)
    assert jnp.allclose(out, ref, atol=1e-5, rtol=1e-5)

    # Second shape exercises padding + the in-kernel chunk loop.
    x2 = jax.random.normal(jax.random.PRNGKey(1), (2100, 3, 3),
                           dtype=jnp.float32)
    out2 = jax.block_until_ready(solid_angle(x2))
    assert jnp.allclose(out2, _solid_angle_ref(x2), atol=1e-5, rtol=1e-5)

    print("KERNEL_OK")
</pallas_src>

<mosaic_0001>
module attributes {stable_mosaic.version = 11 : i64} {
  func.func @_solid_angle_kernel(%arg0: i32, %arg1: memref<9x16x128xf32, #tpu.memory_space<vmem>>, %arg2: memref<16x128xf32, #tpu.memory_space<vmem>>) attributes {dimension_semantics = [#tpu.dimension_semantics<parallel>], iteration_bounds = array<i64: 1>, scalar_prefetch = 0 : i64, scratch_operands = 0 : i64, tpu.core_type = #tpu.core_type<tc>, window_params = [{transform_indices = @transform_0, window_bounds = array<i64: 9, 16, 128>}, {transform_indices = @transform_1, window_bounds = array<i64: 16, 128>}]} {
    %c0_i32 = arith.constant 0 : i32
    %c16_i32 = arith.constant 16 : i32
    %0 = arith.muli %c0_i32, %c16_i32 : i32
    %1 = tpu.assume_multiple %0, 16 : i32
    %c0 = arith.constant 0 : index
    %2 = arith.index_cast %1 : i32 to index
    %c0_0 = arith.constant 0 : index
    %3 = vector.load %arg1[%c0, %2, %c0_0] : memref<9x16x128xf32, #tpu.memory_space<vmem>>, vector<1x16x128xf32>
    %4 = vector.shape_cast %3 : vector<1x16x128xf32> to vector<16x128xf32>
    %c1 = arith.constant 1 : index
    %5 = arith.index_cast %1 : i32 to index
    %c0_1 = arith.constant 0 : index
    %6 = vector.load %arg1[%c1, %5, %c0_1] : memref<9x16x128xf32, #tpu.memory_space<vmem>>, vector<1x16x128xf32>
    %7 = vector.shape_cast %6 : vector<1x16x128xf32> to vector<16x128xf32>
    %c2 = arith.constant 2 : index
    %8 = arith.index_cast %1 : i32 to index
    %c0_2 = arith.constant 0 : index
    %9 = vector.load %arg1[%c2, %8, %c0_2] : memref<9x16x128xf32, #tpu.memory_space<vmem>>, vector<1x16x128xf32>
    %10 = vector.shape_cast %9 : vector<1x16x128xf32> to vector<16x128xf32>
    %c3 = arith.constant 3 : index
    %11 = arith.index_cast %1 : i32 to index
    %c0_3 = arith.constant 0 : index
    %12 = vector.load %arg1[%c3, %11, %c0_3] : memref<9x16x128xf32, #tpu.memory_space<vmem>>, vector<1x16x128xf32>
    %13 = vector.shape_cast %12 : vector<1x16x128xf32> to vector<16x128xf32>
    %c4 = arith.constant 4 : index
    %14 = arith.index_cast %1 : i32 to index
    %c0_4 = arith.constant 0 : index
    %15 = vector.load %arg1[%c4, %14, %c0_4] : memref<9x16x128xf32, #tpu.memory_space<vmem>>, vector<1x16x128xf32>
    %16 = vector.shape_cast %15 : vector<1x16x128xf32> to vector<16x128xf32>
    %c5 = arith.constant 5 : index
    %17 = arith.index_cast %1 : i32 to index
    %c0_5 = arith.constant 0 : index
    %18 = vector.load %arg1[%c5, %17, %c0_5] : memref<9x16x128xf32, #tpu.memory_space<vmem>>, vector<1x16x128xf32>
    %19 = vector.shape_cast %18 : vector<1x16x128xf32> to vector<16x128xf32>
    %c6 = arith.constant 6 : index
    %20 = arith.index_cast %1 : i32 to index
    %c0_6 = arith.constant 0 : index
    %21 = vector.load %arg1[%c6, %20, %c0_6] : memref<9x16x128xf32, #tpu.memory_space<vmem>>, vector<1x16x128xf32>
    %22 = vector.shape_cast %21 : vector<1x16x128xf32> to vector<16x128xf32>
    %c7 = arith.constant 7 : index
    %23 = arith.index_cast %1 : i32 to index
    %c0_7 = arith.constant 0 : index
    %24 = vector.load %arg1[%c7, %23, %c0_7] : memref<9x16x128xf32, #tpu.memory_space<vmem>>, vector<1x16x128xf32>
    %25 = vector.shape_cast %24 : vector<1x16x128xf32> to vector<16x128xf32>
    %c8 = arith.constant 8 : index
    %26 = arith.index_cast %1 : i32 to index
    %c0_8 = arith.constant 0 : index
    %27 = vector.load %arg1[%c8, %26, %c0_8] : memref<9x16x128xf32, #tpu.memory_space<vmem>>, vector<1x16x128xf32>
    %28 = vector.shape_cast %27 : vector<1x16x128xf32> to vector<16x128xf32>
    %29 = arith.mulf %16, %28 : vector<16x128xf32>
    %30 = arith.mulf %19, %25 : vector<16x128xf32>
    %31 = arith.subf %29, %30 : vector<16x128xf32>
    %32 = arith.mulf %19, %22 : vector<16x128xf32>
    %33 = arith.mulf %13, %28 : vector<16x128xf32>
    %34 = arith.subf %32, %33 : vector<16x128xf32>
    %35 = arith.mulf %13, %25 : vector<16x128xf32>
    %36 = arith.mulf %16, %22 : vector<16x128xf32>
    %37 = arith.subf %35, %36 : vector<16x128xf32>
    %38 = arith.mulf %4, %31 : vector<16x128xf32>
    %39 = arith.mulf %7, %34 : vector<16x128xf32>
    %40 = arith.addf %38, %39 : vector<16x128xf32>
    %41 = arith.mulf %10, %37 : vector<16x128xf32>
    %42 = arith.addf %40, %41 : vector<16x128xf32>
    %43 = arith.mulf %4, %4 : vector<16x128xf32>
    %44 = arith.mulf %7, %7 : vector<16x128xf32>
    %45 = arith.addf %43, %44 : vector<16x128xf32>
    %46 = arith.mulf %10, %10 : vector<16x128xf32>
    %47 = arith.addf %45, %46 : vector<16x128xf32>
    %48 = math.sqrt %47 : vector<16x128xf32>
    %49 = arith.mulf %13, %13 : vector<16x128xf32>
    %50 = arith.mulf %16, %16 : vector<16x128xf32>
    %51 = arith.addf %49, %50 : vector<16x128xf32>
    %52 = arith.mulf %19, %19 : vector<16x128xf32>
    %53 = arith.addf %51, %52 : vector<16x128xf32>
    %54 = math.sqrt %53 : vector<16x128xf32>
    %55 = arith.mulf %22, %22 : vector<16x128xf32>
    %56 = arith.mulf %25, %25 : vector<16x128xf32>
    %57 = arith.addf %55, %56 : vector<16x128xf32>
    %58 = arith.mulf %28, %28 : vector<16x128xf32>
    %59 = arith.addf %57, %58 : vector<16x128xf32>
    %60 = math.sqrt %59 : vector<16x128xf32>
    %61 = arith.mulf %4, %13 : vector<16x128xf32>
    %62 = arith.mulf %7, %16 : vector<16x128xf32>
    %63 = arith.addf %61, %62 : vector<16x128xf32>
    %64 = arith.mulf %10, %19 : vector<16x128xf32>
    %65 = arith.addf %63, %64 : vector<16x128xf32>
    %66 = arith.mulf %13, %22 : vector<16x128xf32>
    %67 = arith.mulf %16, %25 : vector<16x128xf32>
    %68 = arith.addf %66, %67 : vector<16x128xf32>
    %69 = arith.mulf %19, %28 : vector<16x128xf32>
    %70 = arith.addf %68, %69 : vector<16x128xf32>
    %71 = arith.mulf %4, %22 : vector<16x128xf32>
    %72 = arith.mulf %7, %25 : vector<16x128xf32>
    %73 = arith.addf %71, %72 : vector<16x128xf32>
    %74 = arith.mulf %10, %28 : vector<16x128xf32>
    %75 = arith.addf %73, %74 : vector<16x128xf32>
    %76 = arith.mulf %48, %54 : vector<16x128xf32>
    %77 = arith.mulf %76, %60 : vector<16x128xf32>
    %78 = arith.mulf %70, %48 : vector<16x128xf32>
    %79 = arith.addf %77, %78 : vector<16x128xf32>
    %80 = arith.mulf %75, %54 : vector<16x128xf32>
    %81 = arith.addf %79, %80 : vector<16x128xf32>
    %82 = arith.mulf %65, %60 : vector<16x128xf32>
    %83 = arith.addf %81, %82 : vector<16x128xf32>
    %84 = math.atan2 %42, %83 : vector<16x128xf32>
    %cst = arith.constant 2.000000e+00 : f32
    %85 = vector.broadcast %cst : f32 to vector<16x128xf32>
    %86 = arith.mulf %85, %84 : vector<16x128xf32>
    %87 = arith.index_cast %1 : i32 to index
    %c0_9 = arith.constant 0 : index
    %88 = vector.load %arg2[%87, %c0_9] : memref<16x128xf32, #tpu.memory_space<vmem>>, vector<16x128xf32>
    tpu.vector_store %arg2[%87, %c0_9], %86 {strides = array<i32>} : memref<16x128xf32, #tpu.memory_space<vmem>>, vector<16x128xf32>,
    %c1_i32 = arith.constant 1 : i32
    return
  }
  func.func @transform_0(%arg0: i32) -> (i32, i32, i32) {
    %c0_i32 = arith.constant 0 : i32
    %c0_i32_0 = arith.constant 0 : i32
    %c0_i32_1 = arith.constant 0 : i32
    return %c0_i32, %arg0, %c0_i32_0 : i32, i32, i32
  }
  func.func @transform_1(%arg0: i32) -> (i32, i32) {
    %c0_i32 = arith.constant 0 : i32
    %c0_i32_0 = arith.constant 0 : i32
    return %arg0, %c0_i32 : i32, i32
  }
}

</mosaic_0001>

<bundles_post_ra>
// kernel: solid_angle.1
= control target key start
LH: loop header
LB: loop body
LE: loop exit
PB: predicated region body
PF: predicated region fallthrough
CT: control target
= control target key end

     0   :  { %s779_s0 = inlined_call_operand.vmem [shape: f32[9,16,128], index: 0, kind: input, shape index: {}]   ;;  %s780_s1 = inlined_call_operand.vmem [shape: f32[16,128], index: 1, kind: output, shape index: {}]  }
   0x1   :  { %v403_v0 = vld [vmem:[%s779_s0] sm:$0xff]  ;;  %v408_v1 = vld [vmem:[%s779_s0 + $0x8] sm:$0xff]  ;;  %v413_v2 = vld [vmem:[%s779_s0 + $0x10] sm:$0xff] }
   0x2   :  { %v418_v3 = vld [vmem:[%s779_s0 + $0x18] sm:$0xff]  ;;  %v423_v4 = vld [vmem:[%s779_s0 + $0x20] sm:$0xff]  ;;  %v70_v5 = vmul.f32 %v403_v0, %v403_v0  ;;  %v71_v6 = vmul.f32 %v408_v1, %v408_v1  ;;  %v72_v7 = vmul.f32 %v413_v2, %v413_v2  ;;  %v434_v8 = vld [vmem:[%s779_s0 + $0x28] sm:$0xff] }
   0x3   :  { %v439_v9 = vld [vmem:[%s779_s0 + $0x30] sm:$0xff]  ;;  %v444_v10 = vld [vmem:[%s779_s0 + $0x38] sm:$0xff]  ;;  %v73_v11 = vmul.f32 %v418_v3, %v418_v3  ;;  %v451_v12 = vld [vmem:[%s779_s0 + $0x40] sm:$0xff]  ;;  %v76_v19 = vmul.f32 %v423_v4, %v423_v4  ;;  %v77_v26 = vmul.f32 %v434_v8, %v434_v8 }
   0x4   :  { %v456_v13 = vld [vmem:[%s779_s0 + $0x48] sm:$0xff]  ;;  %v461_v14 = vld [vmem:[%s779_s0 + $0x50] sm:$0xff]  ;;  %v466_v15 = vld [vmem:[%s779_s0 + $0x58] sm:$0xff]  ;;  %v74_v18 = vadd.f32 %v72_v7, %v70_v5  ;;  %v104_v34 = vmul.f32 %v439_v9, %v439_v9  ;;  %v105_v35 = vmul.f32 %v444_v10, %v444_v10  ;;  %v106_v45 = vmul.f32 %v451_v12, %v451_v12 }
   0x5   :  { %v471_v16 = vld [vmem:[%s779_s0 + $0x60] sm:$0xff]  ;;  %v476_v17 = vld [vmem:[%s779_s0 + $0x70] sm:$0xff]  ;;  %v483_v20 = vld [vmem:[%s779_s0 + $0x78] sm:$0xff]  ;;  %v75_v25 = vadd.f32 %v73_v11, %v71_v6  ;;  %v107_v46 = vmul.f32 %v456_v13, %v456_v13  ;;  %v110_v48 = vmul.f32 %v461_v14, %v461_v14  ;;  %v111_v49 = vmul.f32 %v466_v15, %v466_v15 }
   0x6   :  { %v488_v21 = vld [vmem:[%s779_s0 + $0x80] sm:$0xff]  ;;  %v493_v22 = vld [vmem:[%s779_s0 + $0x88] sm:$0xff]  ;;  %v44_v23 = vmul.f32 %v476_v17, %v461_v14  ;;  %v48_v24 = vmul.f32 %v471_v16, %v461_v14  ;;  %v45_v30 = vmul.f32 %v483_v20, %v466_v15  ;;  %v54_v36 = vmul.f32 %v476_v17, %v439_v9 }
   0x7   :  { %v504_v27 = vld [vmem:[%s779_s0 + $0x68] sm:$0xff]  ;;  %v42_v28 = vmul.f32 %v488_v21, %v451_v12  ;;  %v43_v29 = vmul.f32 %v493_v22, %v456_v13  ;;  %v50_v31 = vmul.f32 %v488_v21, %v439_v9  ;;  %v51_v33 = vmul.f32 %v493_v22, %v444_v10 }
   0x8   :  { %v49_v32 = vmul.f32 %v504_v27, %v466_v15  ;;  %v55_v37 = vmul.f32 %v483_v20, %v444_v10  ;;  %v56_v38 = vmul.f32 %v471_v16, %v451_v12  ;;  %v528_v39 = vadd.f32 %v76_v19, %v74_v18 }
   0x9   :  { %v46_v40 = vsub.f32 %v42_v28, %v44_v23  ;;  %v47_v41 = vsub.f32 %v43_v29, %v45_v30  ;;  %v57_v42 = vmul.f32 %v504_v27, %v456_v13  ;;  %v532_v43 = vadd.f32 %v77_v26, %v75_v25 }
   0xa   :  { %v52_v44 = vsub.f32 %v48_v24, %v50_v31  ;;  %372 = vrsqrt.f32 %v528_v39  ;;  %v53_v47 = vsub.f32 %v49_v32, %v51_v33  ;;  %v58_v50 = vsub.f32 %v54_v36, %v56_v38 }
   0xb   :  { %374 = vrsqrt.f32 %v532_v43  ;;  %v59_v51 = vsub.f32 %v55_v37, %v57_v42  ;;  %v60_v52 = vmul.f32 %v46_v40, %v403_v0  ;;  %v61_v53 = vmul.f32 %v47_v41, %v408_v1 }
   0xc   :  { %v62_v54 = vmul.f32 %v413_v2, %v52_v44  ;;  %v108_v55 = vadd.f32 %v106_v45, %v104_v34  ;;  %v109_v56 = vadd.f32 %v107_v46, %v105_v35  ;;  %v138_v57 = vmul.f32 %v471_v16, %v471_v16 }
   0xd   :  { %v63_v58 = vmul.f32 %v418_v3, %v53_v47  ;;  %v139_v59 = vmul.f32 %v504_v27, %v504_v27  ;;  %v140_v60 = vmul.f32 %v476_v17, %v476_v17  ;;  %v141_v61 = vmul.f32 %v483_v20, %v483_v20 }
   0xe   :  { %v556_v63 = vadd.f32 %v110_v48, %v108_v55  ;;  %v558_v5 = vadd.f32 %v111_v49, %v109_v56  ;;  %v144_v6 = vmul.f32 %v488_v21, %v488_v21  ;;  %v145_v7 = vmul.f32 %v493_v22, %v493_v22 }
   0xf   :  { %v565_v11 = vmul.f32 %v423_v4, %v58_v50  ;;  %v142_v19 = vadd.f32 %v140_v60, %v138_v57  ;;  %v143_v23 = vadd.f32 %v141_v61, %v139_v59  ;;  %v568_v25 = vadd.f32 %v62_v54, %v60_v52 }
  0x10   :  { %v373_v62 = vpop.eup %372  ;;  %v571_v26 = vmul.f32 %v434_v8, %v59_v51  ;;  %vm87_vm0 = vcmp.eq.f32.partialorder %v528_v39, inf  ;;  %376 = vrsqrt.f32 %v556_v63  ;;  %vm89_vm1 = vcmp.eq.f32.partialorder %v528_v39, 0.0 }
  0x11   :  { %v81_v18 = vmul.f32 %v373_v62, %v528_v39  ;;  %v375_v24 = vpop.eup %374  ;;  %378 = vrsqrt.f32 %v558_v5  ;;  %v578_v30 = vadd.f32 %v63_v58, %v61_v53  ;;  %v90_v31 = vand.u32 2147483648, %v528_v39 }
  0x12   :  { %v93_v29 = vmul.f32 %v375_v24, %v532_v43  ;;  %v581_v32 = vadd.f32 %v144_v6, %v142_v19  ;;  %v583_v33 = vadd.f32 %v145_v7, %v143_v23  ;;  %vm99_vm2 = vcmp.eq.f32.partialorder %v532_v43, inf }
  0x13   :  { %v82_v28 = vmul.f32 %v373_v62, %v81_v18  ;;  %vm101_vm3 = vcmp.eq.f32.partialorder %v532_v43, 0.0  ;;  %v172_v36 = vmul.f32 %v439_v9, %v403_v0  ;;  %v173_v37 = vmul.f32 %v444_v10, %v408_v1 }
  0x14   :  { %v94_v35 = vmul.f32 %v375_v24, %v93_v29  ;;  %380 = vrsqrt.f32 %v581_v32  ;;  %v174_v38 = vmul.f32 %v451_v12, %v413_v2  ;;  %v102_v42 = vand.u32 2147483648, %v532_v43 }
  0x15   :  { %v83_v34 = vmul.f32 0.5, %v82_v28  ;;  %382 = vrsqrt.f32 %v583_v33  ;;  %v124_v45 = vand.u32 2147483648, %v556_v63  ;;  %v136_v46 = vand.u32 2147483648, %v558_v5 }
  0x16   :  { %v95_v41 = vmul.f32 0.5, %v94_v35  ;;  %v377_v44 = vpop.eup %376  ;;  %v158_v47 = vand.u32 2147483648, %v581_v32  ;;  %v175_v48 = vmul.f32 %v456_v13, %v418_v3  ;;  %v170_v53 = vand.u32 2147483648, %v583_v33 }
  0x17   :  { %v84_v40 = vsub.f32 1.5, %v83_v34  ;;  %v379_v49 = vpop.eup %378  ;;  %v115_v52 = vmul.f32 %v377_v44, %v556_v63  ;;  %vm121_vm4 = vcmp.eq.f32.partialorder %v556_v63, inf  ;;  %v605_v55 = vadd.f32 %v174_v38, %v172_v36 }
  0x18   :  { %v96_v51 = vsub.f32 1.5, %v95_v41  ;;  %v127_v54 = vmul.f32 %v379_v49, %v558_v5  ;;  %v607_v56 = vadd.f32 %v175_v48, %v173_v37  ;;  %v611_v57 = vmul.f32 %v461_v14, %v423_v4 }
  0x19   :  { %v85_v50 = vmul.f32 %v373_v62, %v84_v40  ;;  %v116_v60 = vmul.f32 %v377_v44, %v115_v52  ;;  %vm123_vm5 = vcmp.eq.f32.partialorder %v556_v63, 0.0  ;;  %vm133_vm6 = vcmp.eq.f32.partialorder %v558_v5, inf }
  0x1a   :  { %v97_v59 = vmul.f32 %v375_v24, %v96_v51  ;;  %v182_v61 = vmul.f32 %v471_v16, %v439_v9  ;;  %v381_v62 = vpop.eup %380  ;;  %v128_v6 = vmul.f32 %v379_v49, %v127_v54  ;;  %vm135_vm7 = vcmp.eq.f32.partialorder %v558_v5, 0.0 }
  0x1b   :  { %v86_v58 = vmul.f32 %v85_v50, %v528_v39  ;;  %v179_v7 = vmul.f32 %v466_v15, %v434_v8  ;;  %v183_v18 = vmul.f32 %v504_v27, %v444_v10  ;;  %v184_v19 = vmul.f32 %v476_v17, %v451_v12  ;;  %v383_v23 = vpop.eup %382 }
  0x1c   :  { %v98_v9 = vmul.f32 %v97_v59, %v532_v43  ;;  %v117_v28 = vmul.f32 0.5, %v116_v60  ;;  %v149_v29 = vmul.f32 %v381_v62, %v581_v32  ;;  %v129_v35 = vmul.f32 0.5, %v128_v6 }
  0x1d   :  { %v88_v24 = vsel %vm87_vm0, %v528_v39, %v86_v58  ;;  %vm155_vm8 = vcmp.eq.f32.partialorder %v581_v32, inf  ;;  %v161_v10 = vmul.f32 %v383_v23, %v583_v33  ;;  %v185_v12 = vmul.f32 %v483_v20, %v456_v13 }
  0x1e   :  { %v91_v34 = vsel %vm89_vm1, %v90_v31, %v88_v24  ;;  %v100_v36 = vsel %vm99_vm2, %v532_v43, %v98_v9  ;;  %v118_v37 = vsub.f32 1.5, %v117_v28  ;;  %v150_v38 = vmul.f32 %v381_v62, %v149_v29 }
  0x1f   :  { %vm157_vm9 = vcmp.eq.f32.partialorder %v581_v32, 0.0  ;;  %vm167_vm10 = vcmp.eq.f32.partialorder %v583_v33, inf  ;;  %v186_v39 = vadd.f32 %v184_v19, %v182_v61  ;;  %v103_v31 = vsel %vm101_vm3, %v102_v42, %v100_v36 }
  0x20   :  { %v130_v40 = vsub.f32 1.5, %v129_v35  ;;  %v162_v41 = vmul.f32 %v383_v23, %v161_v10  ;;  %v187_v48 = vadd.f32 %v185_v12, %v183_v18  ;;  %v119_v50 = vmul.f32 %v377_v44, %v118_v37 }
  0x21   :  { %v151_v51 = vmul.f32 0.5, %v150_v38  ;;  %v188_v13 = vmul.f32 %v488_v21, %v461_v14  ;;  %v189_v52 = vmul.f32 %v493_v22, %v466_v15  ;;  %v192_v59 = vmul.f32 %v471_v16, %v403_v0 }
  0x22   :  { %v131_v54 = vmul.f32 %v379_v49, %v130_v40  ;;  %v163_v58 = vmul.f32 0.5, %v162_v41  ;;  %v193_v43 = vmul.f32 %v504_v27, %v408_v1  ;;  %v120_v42 = vmul.f32 %v119_v50, %v556_v63 }
  0x23   :  { %v152_v60 = vsub.f32 1.5, %v151_v51  ;;  %v190_v61 = vadd.f32 %v188_v13, %v186_v39  ;;  %v191_v44 = vadd.f32 %v189_v52, %v187_v48  ;;  %v194_v14 = vmul.f32 %v476_v17, %v413_v2 }
  0x24   :  { %v132_v6 = vmul.f32 %v131_v54, %v558_v5  ;;  %v164_v18 = vsub.f32 1.5, %v163_v58  ;;  %v195_v15 = vmul.f32 %v483_v20, %v418_v3  ;;  %v122_v0 = vsel %vm121_vm4, %v556_v63, %v120_v42 }
  0x25   :  { %v153_v16 = vmul.f32 %v381_v62, %v152_v60  ;;  %v198_v1 = vmul.f32 %v488_v21, %v423_v4  ;;  %v199_v27 = vmul.f32 %v493_v22, %v434_v8  ;;  %v125_v49 = vsel %vm123_vm5, %v124_v45, %v122_v0 }
  0x26   :  { %v134_v2 = vsel %vm133_vm6, %v558_v5, %v132_v6  ;;  %v165_v3 = vmul.f32 %v383_v23, %v164_v18  ;;  %v196_v17 = vadd.f32 %v194_v14, %v192_v59  ;;  %v197_v21 = vadd.f32 %v195_v15, %v193_v43 }
  0x27   :  { %v137_v20 = vsel %vm135_vm7, %v136_v46, %v134_v2  ;;  %v154_v4 = vmul.f32 %v153_v16, %v581_v32  ;;  %v202_v8 = vmul.f32 %v125_v49, %v91_v34  ;;  %vm169_vm11 = vcmp.eq.f32.partialorder %v583_v33, 0.0 }
  0x28   :  { %v166_v22 = vmul.f32 %v165_v3, %v583_v33  ;;  %v200_v63 = vadd.f32 %v198_v1, %v196_v17  ;;  %v203_v45 = vmul.f32 %v137_v20, %v103_v31  ;;  %v180_v19 = vadd.f32 %v611_v57, %v605_v55 }
  0x29   :  { %v156_v62 = vsel %vm155_vm8, %v581_v32, %v154_v4  ;;  %v201_v23 = vadd.f32 %v199_v27, %v197_v21  ;;  %v206_v5 = vmul.f32 %v190_v61, %v91_v34  ;;  %v181_v9 = vadd.f32 %v179_v7, %v607_v56 }
  0x2a   :  { %v159_v46 = vsel %vm157_vm9, %v158_v47, %v156_v62  ;;  %v168_v24 = vsel %vm167_vm10, %v583_v33, %v166_v22  ;;  %v207_v28 = vmul.f32 %v191_v44, %v103_v31  ;;  %v210_v10 = vmul.f32 %v200_v63, %v125_v49 }
  0x2b   :  { %v171_v29 = vsel %vm169_vm11, %v170_v53, %v168_v24  ;;  %v204_v35 = vmul.f32 %v202_v8, %v159_v46  ;;  %v211_v57 = vmul.f32 %v201_v23, %v137_v20  ;;  %v695_v34 = vadd.f32 %v565_v11, %v568_v25 }
  0x2c   :  { %v205_v55 = vmul.f32 %v203_v45, %v171_v29  ;;  %v214_v47 = vmul.f32 %v180_v19, %v159_v46  ;;  %v699_v12 = vadd.f32 %v571_v26, %v578_v30  ;;  %v215_v56 = vmul.f32 %v181_v9, %v171_v29 }
  0x2d   :  { %v208_v32 = vadd.f32 %v206_v5, %v204_v35  ;;  %v704_v53 = vand.u32 2147483647, %v695_v34  ;;  %vm266_vm5 = vcmp.ne.f32.partialorder %v695_v34, %v695_v34 }
  0x2e   :  { %v209_v36 = vadd.f32 %v207_v28, %v205_v55  ;;  %v709_v11 = vand.u32 2147483647, %v699_v12  ;;  %vm326_vm11 = vcmp.ne.f32.partialorder %v699_v12, %v699_v12 }
  0x2f   :  { %v212_v7 = vadd.f32 %v210_v10, %v208_v32  ;;  %vm272_vm8 = vcmp.eq.s32.totalorder %v704_v53, inf }
  0x30   :  { %v213_v37 = vadd.f32 %v211_v57, %v209_v36 }
  0x31   :  { %v701_v33 = vadd.f32 %v214_v47, %v212_v7 }
  0x32   :  { %v706_v38 = vadd.f32 %v215_v56, %v213_v37 }
  0x33   :  { %v712_v25 = vand.u32 2147483647, %v701_v33  ;;  %vm265_vm4 = vcmp.ne.f32.partialorder %v701_v33, %v701_v33 }
  0x34   :  { %v715_v26 = vand.u32 2147483647, %v706_v38  ;;  %vm729_vm6 = vmor %vm265_vm4, %vm266_vm5  ;;  %vm325_vm10 = vcmp.ne.f32.partialorder %v706_v38, %v706_v38  ;;  %vm258_vm4 = vcmp.lt.f32.partialorder %v701_v33, 0.0  ;;  %vm263_vm5 = vcmp.eq.f32.partialorder %v695_v34, 0.0 }
  0x35   :  { %v221_v30 = vmax.f32 %v712_v25, %v704_v53  ;;  %v220_v60 = vmin.f32 %v712_v25, %v704_v53  ;;  %vm271_vm7 = vcmp.eq.s32.totalorder %v712_v25, inf }
  0x36   :  { %v281_v39 = vmax.f32 %v715_v26, %v709_v11  ;;  %v280_v6 = vmin.f32 %v715_v26, %v709_v11  ;;  %vm735_vm9 = vmand %vm271_vm7, %vm272_vm8  ;;  %vm318_vm7 = vcmp.lt.f32.partialorder %v706_v38, 0.0  ;;  %vm323_vm8 = vcmp.eq.f32.partialorder %v699_v12, 0.0 }
  0x37   :  { %384 = vrcp.f32 %v221_v30  ;;  %vm227_vm12 = vweird.f32 %v221_v30  ;;  %v233_v48 = vand.u32 2147483648, %v221_v30  ;;  %v231_v13 = vand.u32 2147483647, %v221_v30 }
  0x38   :  { %386 = vrcp.f32 %v281_v39  ;;  %v293_v52 = vand.u32 2147483648, %v281_v39  ;;  %vm287_vm14 = vweird.f32 %v281_v39  ;;  %v291_v58 = vand.u32 2147483647, %v281_v39 }
  0x39   :  { %v234_v43 = vor.u32 1.1754944e-38, %v233_v48  ;;  %vm232_vm1 = vcmp.eq.f32.partialorder %v231_v13, 8.507059e+37 }
  0x3a   :  { %v294_v44 = vor.u32 1.1754944e-38, %v293_v52  ;;  %vm292_vm3 = vcmp.eq.f32.partialorder %v291_v58, 8.507059e+37 }
  0x3d   :  { %v385_v31 = vpop.eup %384 }
  0x3e   :  { %v387_v40 = vpop.eup %386  ;;  %v223_v41 = vmul.f32 %v385_v31, %v221_v30  ;;  %vm228_vm13 = vweird.f32 %v385_v31 }
  0x3f   :  { %v283_v50 = vmul.f32 %v387_v40, %v281_v39  ;;  %vm288_vm15 = vweird.f32 %v387_v40  ;;  %vm229_vm0 = vmor %vm227_vm12, %vm228_vm13  ;;  %vm331_vm13 = vcmp.eq.s32.totalorder %v715_v26, inf }
  0x40   :  { %v224_v51 = vsub.f32 1.0, %v223_v41  ;;  %vm289_vm2 = vmor %vm287_vm14, %vm288_vm15  ;;  %vm332_vm14 = vcmp.eq.s32.totalorder %v709_v11, inf }
  0x41   :  { %v284_v54 = vsub.f32 1.0, %v283_v50  ;;  %vm743_vm12 = vmor %vm325_vm10, %vm326_vm11 }
  0x42   :  { %v225_v59 = vmul.f32 %v385_v31, %v224_v51  ;;  %vm749_vm15 = vmand %vm331_vm13, %vm332_vm14 }
  0x43   :  { %v285_v42 = vmul.f32 %v387_v40, %v284_v54 }
  0x44   :  { %v226_v61 = vadd.f32 %v385_v31, %v225_v59 }
  0x45   :  { %v286_v18 = vadd.f32 %v387_v40, %v285_v42  ;;  %v388_v42 = vmov 0.0  }
  0x46   :  { %v230_v14 = vsel %vm229_vm0, %v385_v31, %v226_v61  ;;  %vm255_vm0 = vcmp.gt.f32.partialorder %v704_v53, %v712_v25 }
  0x47   :  { %v235_v15 = vsel %vm232_vm1, %v234_v43, %v230_v14  ;;  %v290_v0 = vsel %vm289_vm2, %v387_v40, %v286_v18  ;;  %vm261_vm1 = vcmp.lt.s32.totalorder %v701_v33, 0  ;;  %vm315_vm2 = vcmp.gt.f32.partialorder %v709_v11, %v715_v26 }
  0x48   :  { %v236_v16 = vmul.f32 %v235_v15, %v220_v60  ;;  %v295_v1 = vsel %vm292_vm3, %v294_v44, %v290_v0  ;;  %vm321_vm3 = vcmp.lt.s32.totalorder %v706_v38, 0  ;;  %v262_v60 = vsel %vm261_vm1, 3.1415927, %v388_v42 }
  0x49   :  { %v296_v27 = vmul.f32 %v295_v1, %v280_v6  ;;  %v322_v25 = vsel %vm321_vm3, 3.1415927, %v388_v42  ;;  %v389_v11 = vmov 0.7853982   ;;  %v276_v15 = vand.u32 2147483648, %v695_v34 }
  0x4a   :  { %v237_v49 = vmul.f32 %v236_v16, %v236_v16  ;;  %v270_v26 = vsel %vm258_vm4, 2.3561945, %v389_v11  ;;  %v330_v14 = vsel %vm318_vm7, 2.3561945, %v389_v11  ;;  %v336_v1 = vand.u32 2147483648, %v699_v12 }
  0x4b   :  { %v297_v2 = vmul.f32 %v296_v27, %v296_v27 }
  0x4c   :  { %v238_v3 = vmul.f32 0.002785687, %v237_v49 }
  0x4d   :  { %v298_v17 = vmul.f32 0.002785687, %v297_v2 }
  0x4e   :  { %v239_v20 = vadd.f32 -0.015866, %v238_v3 }
  0x4f   :  { %v299_v4 = vadd.f32 -0.015866, %v298_v17 }
  0x50   :  { %v240_v21 = vmul.f32 %v239_v20, %v237_v49 }
  0x51   :  { %v300_v8 = vmul.f32 %v299_v4, %v297_v2 }
  0x52   :  { %v241_v22 = vadd.f32 0.04247222, %v240_v21 }
  0x53   :  { %v301_v63 = vadd.f32 0.04247222, %v300_v8 }
  0x54   :  { %v242_v45 = vmul.f32 %v241_v22, %v237_v49 }
  0x55   :  { %v302_v19 = vmul.f32 %v301_v63, %v297_v2 }
  0x56   :  { %v243_v23 = vadd.f32 -0.074975304, %v242_v45 }
  0x57   :  { %v303_v46 = vadd.f32 -0.074975304, %v302_v19 }
  0x58   :  { %v244_v24 = vmul.f32 %v243_v23, %v237_v49 }
  0x59   :  { %v304_v9 = vmul.f32 %v303_v46, %v297_v2 }
  0x5a   :  { %v245_v29 = vadd.f32 0.1064488, %v244_v24 }
  0x5b   :  { %v305_v10 = vadd.f32 0.1064488, %v304_v9 }
  0x5c   :  { %v246_v55 = vmul.f32 %v245_v29, %v237_v49 }
  0x5d   :  { %v306_v57 = vmul.f32 %v305_v10, %v297_v2 }
  0x5e   :  { %v247_v32 = vadd.f32 -0.14207031, %v246_v55 }
  0x5f   :  { %v307_v47 = vadd.f32 -0.14207031, %v306_v57 }
  0x60   :  { %v248_v36 = vmul.f32 %v247_v32, %v237_v49 }
  0x61   :  { %v308_v56 = vmul.f32 %v307_v47, %v297_v2 }
  0x62   :  { %v249_v7 = vadd.f32 0.19993454, %v248_v36 }
  0x63   :  { %v309_v37 = vadd.f32 0.19993454, %v308_v56 }
  0x64   :  { %v250_v30 = vmul.f32 %v249_v7, %v237_v49 }
  0x65   :  { %v310_v39 = vmul.f32 %v309_v37, %v297_v2 }
  0x66   :  { %v251_v31 = vadd.f32 -0.33333147, %v250_v30 }
  0x67   :  { %v311_v40 = vadd.f32 -0.33333147, %v310_v39 }
  0x68   :  { %v252_v41 = vmul.f32 %v251_v31, %v237_v49 }
  0x69   :  { %v312_v48 = vmul.f32 %v311_v40, %v297_v2 }
  0x6a   :  { %v253_v50 = vmul.f32 %v252_v41, %v236_v16 }
  0x6b   :  { %v313_v51 = vmul.f32 %v312_v48, %v296_v27 }
  0x6c   :  { %v254_v13 = vadd.f32 %v253_v50, %v236_v16 }
  0x6d   :  { %v314_v52 = vadd.f32 %v313_v51, %v296_v27 }
  0x6e   :  { %v256_v54 = vsub.f32 1.5707964, %v254_v13 }
  0x6f   :  { %v316_v58 = vsub.f32 1.5707964, %v314_v52 }
  0x70   :  { %v257_v59 = vsel %vm255_vm0, %v256_v54, %v254_v13 }
  0x71   :  { %v259_v43 = vsub.f32 3.1415927, %v257_v59  ;;  %v317_v61 = vsel %vm315_vm2, %v316_v58, %v314_v52 }
  0x72   :  { %v319_v53 = vsub.f32 3.1415927, %v317_v61 }
  0x73   :  { %v260_v44 = vsel %vm258_vm4, %v259_v43, %v257_v59 }
  0x74   :  { %v264_v6 = vsel %vm263_vm5, %v262_v60, %v260_v44  ;;  %v320_v18 = vsel %vm318_vm7, %v319_v53, %v317_v61 }
  0x75   :  { %v268_v33 = vsel %vm729_vm6, nan, %v264_v6  ;;  %v324_v0 = vsel %vm323_vm8, %v322_v25, %v320_v18 }
  0x76   :  { %v274_v16 = vsel %vm735_vm9, %v270_v26, %v268_v33  ;;  %v328_v38 = vsel %vm743_vm12, nan, %v324_v0 }
  0x77   :  { %v275_v27 = vand.u32 2147483647, %v274_v16  ;;  %v334_v49 = vsel %vm749_vm15, %v330_v14, %v328_v38 }
  0x78   :  { %v335_v2 = vand.u32 2147483647, %v334_v49 }
  0x79   :  { %v277_v3 = vor.u32 %v276_v15, %v275_v27 }
  0x7a   :  { %v337_v17 = vor.u32 %v336_v1, %v335_v2 }
  0x7b   :  { %v338_v20 = vmul.f32 2.0, %v277_v3 }
  0x7c   :  { %v339_v4 = vmul.f32 2.0, %v337_v17 }
  0x7d   :  { %340 = vst [vmem:[%s780_s1] sm:$0xff] %v338_v20 }
  0x7e   :  { %341 = vst [vmem:[%s780_s1 + $0x8] sm:$0xff] %v339_v4 }

</bundles_post_ra>
